<compile_context>
chip_gen: v7x
topology: tpu7x:2x2x1
jax: 0.10.0
libtpu: 0.0.40
codegen_flags: <defaults>
</compile_context>

<pallas_src>
import jax
import jax.numpy as jnp
from jax import lax
from jax.experimental import pallas as pl
from jax.experimental.pallas import tpu as pltpu

EPS = 1e-8


def cos_scorer_kernel(x_ref, s_ref, o_ref):
    # x_ref block: (1, tT, D), s_ref block: (1, N, D), o_ref block: (1, N, tT)
    x = x_ref[0]                 # (tT, D), native dtype -> straight into MXU
    s = s_ref[0]                 # (N, D),  native dtype

    # (N, D) x (tT, D) contracted on D -> (N, tT) on the MXU, f32 accumulation.
    # T stays on the lane dim -> lane-dense output even for small N.
    dots = lax.dot_general(
        s, x,
        dimension_numbers=(((1,), (1,)), ((), ())),
        preferred_element_type=jnp.float32,
    )

    # L2 norms along the feature axis (f32 only on the reduction path).
    x_f32 = x.astype(jnp.float32)
    s_f32 = s.astype(jnp.float32)

    # ||x||^2 per row, computed on the MXU via a ones-vector contraction so the
    # result lands directly in the lane-oriented (1, tT) layout (no XLU
    # transpose needed); the MXU has plenty of slack here since N is small.
    x_sq_sum = lax.dot_general(
        jnp.ones((1, x_f32.shape[-1]), jnp.float32), x_f32 * x_f32,
        dimension_numbers=(((1,), (1,)), ((), ())),
        preferred_element_type=jnp.float32,
    )                                                                     # (1, tT)
    x_norm = jnp.sqrt(x_sq_sum)                                           # (1, tT)
    s_norm = jnp.sqrt(jnp.sum(s_f32 * s_f32, axis=-1, keepdims=True))     # (N, 1)

    denom = jnp.maximum(s_norm * x_norm, EPS)                             # (N, tT)
    o_ref[0] = (dots / denom).astype(o_ref.dtype)


def cos_scorer(xs_pad: jax.Array, spk_emb: jax.Array, *, t_tile: int = 512) -> jax.Array:
    """xs_pad: [B, T, D], spk_emb: [B, N, D] -> scores: [B, T, N]."""
    B, T, D = xs_pad.shape
    Bs, N, Ds = spk_emb.shape
    assert B == Bs and D == Ds

    out_dtype = jnp.result_type(xs_pad.dtype, spk_emb.dtype)

    if T <= t_tile:
        # Single T tile per batch: full-extent block, no (8, 128) constraint.
        tT = T
        T_pad = T
    else:
        # Tiled path: tT is the output lane dim -> must be a multiple of 128.
        assert t_tile % 128 == 0, "t_tile must be a multiple of 128 when T > t_tile"
        tT = t_tile
        T_pad = pl.cdiv(T, tT) * tT

    x = xs_pad
    if T_pad != T:
        # Zero rows score exactly 0 (norm 0 -> denom = eps); sliced off below.
        x = jnp.pad(x, ((0, 0), (0, T_pad - T), (0, 0)))

    scores_nt = pl.pallas_call(
        cos_scorer_kernel,
        out_shape=jax.ShapeDtypeStruct((B, N, T_pad), out_dtype),
        grid_spec=pltpu.PrefetchScalarGridSpec(
            num_scalar_prefetch=0,
            grid=(B, T_pad // tT),
            in_specs=[
                pl.BlockSpec((1, tT, D), lambda b, t: (b, t, 0)),   # xs_pad tile
                pl.BlockSpec((1, N, D), lambda b, t: (b, 0, 0)),    # spk_emb (index invariant over t)
            ],
            out_specs=pl.BlockSpec((1, N, tT), lambda b, t: (b, 0, t)),
        ),
        compiler_params=pltpu.CompilerParams(
            dimension_semantics=("parallel", "parallel"),
        ),
    )(x, spk_emb)

    # Lane-dense kernel layout [B, N, T] -> caller layout [B, T, N]; drop T pad.
    scores = jnp.transpose(scores_nt, (0, 2, 1))
    if T_pad != T:
        scores = scores[:, :T, :]
    return scores


def cos_scorer_ref(xs_pad, spk_emb):
    # Pure-JAX reference matching torch.nn.functional.cosine_similarity.
    x = xs_pad[:, :, None, :].astype(jnp.float32)   # [B, T, 1, D]
    s = spk_emb[:, None, :, :].astype(jnp.float32)  # [B, 1, N, D]
    dot = jnp.sum(x * s, axis=-1)
    denom = jnp.maximum(
        jnp.linalg.norm(x, axis=-1) * jnp.linalg.norm(s, axis=-1), EPS
    )
    return dot / denom


if __name__ == "__main__":
    key = jax.random.PRNGKey(0)
    k1, k2, k3, k4 = jax.random.split(key, 4)

    # Small shapes consistent with the module's forward.
    B, T, N, D = 2, 16, 8, 32
    xs_pad = jax.random.normal(k1, (B, T, D), dtype=jnp.float32)
    spk_emb = jax.random.normal(k2, (B, N, D), dtype=jnp.float32)

    scores = cos_scorer(xs_pad, spk_emb)
    jax.block_until_ready(scores)
    ref = cos_scorer_ref(xs_pad, spk_emb)
    assert scores.shape == (B, T, N)
    assert jnp.allclose(scores, ref, atol=2e-5, rtol=1e-5), "mismatch vs reference (small)"

    # Also exercise the tiled + padded path (T > t_tile, N not a multiple of 8).
    B2, T2, N2, D2 = 2, 300, 4, 64
    xs2 = jax.random.normal(k3, (B2, T2, D2), dtype=jnp.float32)
    se2 = jax.random.normal(k4, (B2, N2, D2), dtype=jnp.float32)
    scores2 = cos_scorer(xs2, se2, t_tile=128)
    jax.block_until_ready(scores2)
    ref2 = cos_scorer_ref(xs2, se2)
    assert scores2.shape == (B2, T2, N2)
    assert jnp.allclose(scores2, ref2, atol=2e-5, rtol=1e-5), "mismatch vs reference (tiled)"

    print("KERNEL_OK")
</pallas_src>

<mosaic_0001>
module attributes {stable_mosaic.version = 11 : i64} {
  func.func @cos_scorer_kernel(%arg0: i32, %arg1: i32, %arg2: memref<1x16x32xf32, #tpu.memory_space<vmem>>, %arg3: memref<1x8x32xf32, #tpu.memory_space<vmem>>, %arg4: memref<1x8x16xf32, #tpu.memory_space<vmem>>) attributes {dimension_semantics = [#tpu.dimension_semantics<parallel>, #tpu.dimension_semantics<parallel>], iteration_bounds = array<i64: 2, 1>, scalar_prefetch = 0 : i64, scratch_operands = 0 : i64, tpu.core_type = #tpu.core_type<tc>, window_params = [{transform_indices = @transform_0, window_bounds = array<i64: 1, 16, 32>}, {transform_indices = @transform_1, window_bounds = array<i64: 1, 8, 32>}, {transform_indices = @transform_2, window_bounds = array<i64: 1, 8, 16>}]} {
    %c0 = arith.constant 0 : index
    %c0_0 = arith.constant 0 : index
    %c0_1 = arith.constant 0 : index
    %0 = vector.load %arg2[%c0, %c0_0, %c0_1] : memref<1x16x32xf32, #tpu.memory_space<vmem>>, vector<1x16x32xf32>
    %1 = vector.shape_cast %0 : vector<1x16x32xf32> to vector<16x32xf32>
    %c0_2 = arith.constant 0 : index
    %c0_3 = arith.constant 0 : index
    %c0_4 = arith.constant 0 : index
    %2 = vector.load %arg3[%c0_2, %c0_3, %c0_4] : memref<1x8x32xf32, #tpu.memory_space<vmem>>, vector<1x8x32xf32>
    %3 = vector.shape_cast %2 : vector<1x8x32xf32> to vector<8x32xf32>
    %cst = arith.constant dense<0.000000e+00> : vector<8x16xf32>
    %4 = tpu.matmul %3, %1, %cst {dimension_numbers = #tpu.dot_dimension_numbers<[1], [1], [0], [0], [0, 0, 1, 0], [], []>} : vector<8x32xf32>, vector<16x32xf32>, vector<8x16xf32> -> vector<8x16xf32>
    %cst_5 = arith.constant 1.000000e+00 : f32
    %5 = vector.broadcast %cst_5 : f32 to vector<1x32xf32>
    %6 = arith.mulf %1, %1 : vector<16x32xf32>
    %cst_6 = arith.constant dense<0.000000e+00> : vector<1x16xf32>
    %7 = tpu.matmul %5, %6, %cst_6 {dimension_numbers = #tpu.dot_dimension_numbers<[1], [1], [0], [0], [0, 0, 1, 0], [], []>} : vector<1x32xf32>, vector<16x32xf32>, vector<1x16xf32> -> vector<1x16xf32>
    %8 = math.sqrt %7 : vector<1x16xf32>
    %9 = arith.mulf %3, %3 : vector<8x32xf32>
    %cst_7 = arith.constant dense<0.000000e+00> : vector<8xf32>
    %10 = vector.multi_reduction <add>, %9, %cst_7 [1] : vector<8x32xf32> to vector<8xf32>
    %11 = vector.shape_cast %10 : vector<8xf32> to vector<8x1xf32>
    %12 = math.sqrt %11 : vector<8x1xf32>
    %13 = vector.broadcast %12 : vector<8x1xf32> to vector<8x16xf32>
    %14 = vector.broadcast %8 : vector<1x16xf32> to vector<8x16xf32>
    %15 = arith.mulf %13, %14 : vector<8x16xf32>
    %cst_8 = arith.constant 9.99999993E-9 : f32
    %16 = vector.broadcast %cst_8 : f32 to vector<8x16xf32>
    %17 = arith.maximumf %15, %16 : vector<8x16xf32>
    %18 = arith.divf %4, %17 : vector<8x16xf32>
    %c0_9 = arith.constant 0 : index
    %c0_10 = arith.constant 0 : index
    %c0_11 = arith.constant 0 : index
    %19 = vector.load %arg4[%c0_9, %c0_10, %c0_11] : memref<1x8x16xf32, #tpu.memory_space<vmem>>, vector<1x8x16xf32>
    %20 = vector.shape_cast %19 : vector<1x8x16xf32> to vector<8x16xf32>
    %21 = vector.shape_cast %18 : vector<8x16xf32> to vector<1x8x16xf32>
    tpu.vector_store %arg4[%c0_9, %c0_10, %c0_11], %21 {strides = array<i32>} : memref<1x8x16xf32, #tpu.memory_space<vmem>>, vector<1x8x16xf32>,
    return
  }
  func.func @transform_0(%arg0: i32, %arg1: i32) -> (i32, i32, i32) {
    %c0_i32 = arith.constant 0 : i32
    %c0_i32_0 = arith.constant 0 : i32
    return %arg0, %arg1, %c0_i32 : i32, i32, i32
  }
  func.func @transform_1(%arg0: i32, %arg1: i32) -> (i32, i32, i32) {
    %c0_i32 = arith.constant 0 : i32
    %c0_i32_0 = arith.constant 0 : i32
    %c0_i32_1 = arith.constant 0 : i32
    return %arg0, %c0_i32, %c0_i32_0 : i32, i32, i32
  }
  func.func @transform_2(%arg0: i32, %arg1: i32) -> (i32, i32, i32) {
    %c0_i32 = arith.constant 0 : i32
    %c0_i32_0 = arith.constant 0 : i32
    return %arg0, %c0_i32, %arg1 : i32, i32, i32
  }
}

</mosaic_0001>

<bundles_post_ra>
// kernel: tpu_custom_call.1
= control target key start
LH: loop header
LB: loop body
LE: loop exit
PB: predicated region body
PF: predicated region fallthrough
CT: control target
= control target key end

     0   :  { %7 = vsyncpa [#allocation3], 0  ;;  %s1057_s0 = inlined_call_operand.hbm [shape: f32[2,16,32], index: 0, kind: input, shape index: {}]   ;;  %s1058_s1 = inlined_call_operand.hbm [shape: f32[2,8,32], index: 1, kind: input, shape index: {}]   ;;  %s1059_s2 = inlined_call_operand.hbm [shape: f32[2,8,16], index: 2, kind: output, shape index: {}]  }
   0x1   :  { %9 = vsyncpa [#allocation3 + $0x1], 0 }
   0x2   :  { %10 = vsyncpa [#allocation6], 0 }
   0x3   :  { %12 = vsyncpa [#allocation6 + $0x1], 0 }
   0x4   :  { %13 = vsyncpa [#allocation4], 0 }
   0x5   :  { %15 = vsyncpa [#allocation4 + $0x1], 0  ;;  %s833_s9 = smov 0   ;;  %s835_s10 = smov 0  }
   0x6   :  { %s837_s11 = smov 0   ;;  %s839_s12 = smov 0  }
   0x7   :  { %s841_s13 = smov 0   ;;  %s843_s14 = smov 0  }
   0x8 LB: > { %s530_s15 = sadd.s32 4294967295, %s807_s14   ;;  %s531_s16 = sadd.s32 4294967294, %s807_s14   ;;  %s807_s14 = sphi %s843_s14, %s21_s14   ;;  %s803_s13 = sphi %s841_s13, %s1078_s13   ;;  %s799_s12 = sphi %s839_s12, %s1077_s12   ;;  %s795_s11 = sphi %s837_s11, %s1076_s11   ;;  %s791_s10 = sphi %s835_s10, %s1075_s10   ;;  %s787_s9 = sphi %s833_s9, %s1074_s9  }
   0x9   : > { %s33_s17 = sadd.s32 1, %s803_s13  ;;  %s42_s18 = sadd.s32 1, %s795_s11 }
   0xa   : > { %p35_p0 = scmp.ge.s32.totalorder %s33_s17, 2  ;;  %p49_p1 = scmp.ne.s32.totalorder %s795_s11, %s791_s10 }
   0xb   : > { %p50_p2 = scmp.eq.s32.totalorder %s807_s14, 0  ;;  %p55_p3 = scmp.ne.s32.totalorder %s791_s10, %s787_s9 }
   0xc   : > { %s1080_s17 = smov (%p35_p0, %s33_s17), 0  ;;  %p56_p5 = scmp.eq.s32.totalorder %s530_s15, 0 }
   0xd   : > { %p874_p4 = por %p50_p2, %p49_p1  ;;  %s37_s20 = ssub.s32 %s803_s13, %s1080_s17 }
   0xe   : > { %p107_p6 = scmp.eq.s32.totalorder %s530_s15, 1  ;;  %p40_p7 = scmp.eq.s32.totalorder %s37_s20, 0 }
   0xf   : > { %p880_p8 = por %p56_p5, %p55_p3  ;;  %p113_p10 = scmp.eq.s32.totalorder %s531_s16, 1 }
  0x10   : > { %p884_p9 = por %p107_p6, %p49_p1  ;;  %p599_p13 = scmp.lt.s32.totalorder %s807_s14, 2 }
  0x11   : > { %s1063_s21 = scalar_select %p880_p8, 1, 0 }
  0x12   : > { %s1064_s22 = scalar_select %p884_p9, 1, 0 }
  0x13   : > { %s889_s23 = scalar_select %p40_p7, %s795_s11, %s42_s18  }
  0x14   : > { %p891_p11 = por %p113_p10, %p55_p3  ;;  %s898_s25 = sand.u32 1, %s795_s11  }
  0x15   : > { %s534_s26 = sshll.u32 %s898_s25, 4  ;;  %s553_s27 = sshll.u32 %s803_s13, 8 }
  0x16   : > { %s1065_s24 = scalar_select %p891_p11, 1, 0 }
  0x17   : > { %s905_s30 = scalar_lea.hbm %s1057_s0, %s553_s27  ;;  %s137_s3 = scalar_lea.vmem [#allocation2], %s534_s26 }
  0x18   : > { %s146_s4 = sshll.u32 %s137_s3, 4  ;;  %p911_p0 = pnand %p599_p13, %p874_p4  ;;  %s907_s4 = int_to_ptr.vmem [resolvable:$true] %s146_s4 }
  0x19   : > { %s134_s6 = scalar_lea.sflag [#allocation3], %s898_s25  ;;  %s661_s7 = scalar_lea.hbm %s905_s30, 256 }
  0x1a   : > { %p662_p2 = scmp.ne.s32.totalorder %s905_s30, %s661_s7  ;;  %p663_p3 = pneg %p911_p0 }
  0x1b   : > { %s666_s16 = scalar_lea.hbm %s1057_s0, 512  ;;  %p667_p4 = scmp.lt.u32.totalorder %s905_s30, %s1057_s0 }
  0x1c   : > { %p664_p5 = pnand %p663_p3, %p662_p2  ;;  %p668_p7 = scmp.lt.u32.totalorder %s666_s16, %s661_s7 }
  0x1d   : > { %p670_p13 = scmp.lt.u32.totalorder %s661_s7, %s905_s30 }
  0x1e   : > { %p665_p6 = pneg %p664_p5  ;;  %p669_p10 = por %p668_p7, %p667_p4 }
  0x20   : > { %p671_p12 = por %p670_p13, %p669_p10 }
  0x22   : > { %p672_p1 = pnand %p671_p12, %p665_p6 }
  0x24   : > { %675 = shalt.err (!%p672_p1)
}
  0x25   : > { %s676_s20 = scalar_lea.vmem %s907_s4, 256  ;;  %s809_s26 = smov [#allocation2]  }
  0x26   : > { %p677_p2 = scmp.ne.s32.totalorder %s907_s4, %s676_s20  ;;  %s681_s27 = sshll.u32 %s809_s26, 4  ;;  %s682_s27 = int_to_ptr.vmem [resolvable:$false] %s681_s27 }
  0x27   : > { %s683_s28 = scalar_lea.vmem %s682_s27, 512  ;;  %p684_p9 = scmp.lt.s32.totalorder %s907_s4, %s682_s27 }
  0x28   : > { %p679_p5 = pnand %p677_p2, %p663_p3  ;;  %p685_p4 = scmp.lt.s32.totalorder %s683_s28, %s676_s20 }
  0x2a   : > { %p680_p11 = pneg %p679_p5  ;;  %p686_p7 = por %p685_p4, %p684_p9 }
  0x2c   : > { %p687_p10 = pnand %p686_p7, %p680_p11 }
  0x2e   : > { %690 = shalt.err (!%p687_p10)
}
  0x2f   : > { %s810_s29 = smov 128   ;;  %s811_s3 = smov 8  }
  0x30   : > { %591 = dma.hbm_to_vmem [thread:$0]  (!%p911_p0), %s905_s30, 256, %s907_s4, %s134_s6, %s810_s29, %s810_s29, %s811_s3  }
  0x31   : > { %p172_p12 = scmp.lt.s32.totalorder %s807_s14, 3  ;;  %s537_s7 = sshll.u32 %s898_s25, 3 }
  0x32   : > { %s538_s8 = sshll.u32 %s803_s13, 7  ;;  %p1067_p9 = scmp.ge.s32.totalorder %s807_s14, 1 }
  0x33   : > { %s956_s19 = scalar_lea.hbm %s1058_s1, %s538_s8  ;;  %s160_s20 = scalar_lea.vmem [#allocation5], %s537_s7 }
  0x34   : > { %p949_p11 = pnand %p1067_p9, %p172_p12  ;;  %s167_s26 = sshll.u32 %s160_s20, 4  ;;  %s168_s26 = int_to_ptr.vmem [resolvable:$true] %s167_s26 }
  0x35   : > { %s157_s30 = scalar_lea.sflag [#allocation6], %s898_s25  ;;  %s691_s4 = scalar_lea.hbm %s956_s19, 128 }
  0x36   : > { %s1068_s15 = scalar_select %p949_p11, 1, 0 }
  0x37   : > { %p692_p1 = scmp.ne.s32.totalorder %s956_s19, %s691_s4  ;;  %s696_s28 = scalar_lea.hbm %s1058_s1, 256 }
  0x38   : > { %p697_p2 = scmp.lt.u32.totalorder %s956_s19, %s1058_s1  ;;  %p698_p5 = scmp.lt.u32.totalorder %s696_s28, %s691_s4 }
  0x39   : > { %p694_p6 = pnand %p692_p1, %p663_p3  ;;  %p700_p7 = scmp.lt.u32.totalorder %s691_s4, %s956_s19 }
  0x3a   : > { %p699_p4 = por %p698_p5, %p697_p2 }
  0x3b   : > { %p695_p13 = pneg %p694_p6 }
  0x3c   : > { %p701_p10 = por %p700_p7, %p699_p4 }
  0x3e   : > { %p702_p12 = pnand %p701_p10, %p695_p13 }
  0x40   : > { %705 = shalt.err (!%p702_p12)
}
  0x41   : > { %s706_s25 = scalar_lea.vmem %s168_s26, 128  ;;  %s812_s7 = smov [#allocation5]  }
  0x42   : > { %p707_p9 = scmp.ne.s32.totalorder %s168_s26, %s706_s25  ;;  %s711_s8 = sshll.u32 %s812_s7, 4  ;;  %s712_s8 = int_to_ptr.vmem [resolvable:$false] %s711_s8 }
  0x43   : > { %s713_s16 = scalar_lea.vmem %s712_s8, 256  ;;  %p714_p8 = scmp.lt.s32.totalorder %s168_s26, %s712_s8 }
  0x44   : > { %p709_p1 = pnand %p707_p9, %p663_p3  ;;  %p715_p11 = scmp.lt.s32.totalorder %s713_s16, %s706_s25 }
  0x46   : > { %p710_p6 = pneg %p709_p1  ;;  %p716_p2 = por %p715_p11, %p714_p8 }
  0x48   : > { %p717_p5 = pnand %p716_p2, %p710_p6 }
  0x4a   : > { %720 = shalt.err (!%p717_p5)
}
  0x4b   : > { %594 = dma.hbm_to_vmem [thread:$0]  (!%p911_p0), %s956_s19, 128, %s168_s26, %s157_s30  }
  0x4c   : > { %p1069_p13 = scmp.ne.s32.totalorder %s1068_s15, 0 }
  0x4d   : > { %s981_s18 = sand.u32 (!%p1069_p13), 1, %s791_s10   ;;  %p1070_p3 = scmp.ne.s32.totalorder (!%p1069_p13), %s1063_s21, 0 }
  0x4e   : > { %176 = sbr.rel (%p1069_p13) target bundleno = 362 (0x16a), region = 28  ;;  %s540_s20 = sshll.u32 (!%p1069_p13), %s981_s18, 4 }
  0x4f   : > { %s179_s4 = scalar_lea.sflag (!%p1069_p13), [#allocation3], %s981_s18  ;;  %s182_s6 = scalar_lea.vmem (!%p1069_p13), [#allocation2], %s540_s20 }
  0x55   : > { %774 = dma.done.wait (%p1070_p3), %s179_s4, 256  }
  0x56   : > { %776 = vsyncadd (%p1070_p3), %s179_s4, 4294967040  ;;  %s541_s5 = sshll.u32 %s981_s18, 3  ;;  %s188_s15 = scalar_lea.sflag [#allocation6], %s981_s18 }
  0x57   : > { %s191_s19 = scalar_lea.vmem [#allocation5], %s541_s5 }
  0x58   : > { %778 = dma.done.wait (%p1070_p3), %s188_s15, 128  }
  0x59   : > { %780 = vsyncadd (%p1070_p3), %s188_s15, 4294967168  ;;  %v813_v0 = vmov 0.0|0.0   ;;  %vm814_vm0 = vmmov 0   ;;  %v815_v1 = vmov 0.0   ;;  %vm221_vm1 = vcmask 261120   ;;  %v218_v2 = vld [vmem:[%s182_s6] sm:$0xff] }
  0x5a   : > { %578 = vmatprep.subr.bf16.mxu1 %v813_v0  ;;  %571 = vmatprep.mubr.msk.f32.mxu1 %vm814_vm0, %v815_v1  ;;  %v219_v3 = vld [vmem:[%s182_s6 + $0x8] sm:$0xff]  ;;  %v220_v4 = vld [vmem:[%s191_s19] sm:$0xff]  ;;  %v301_v5 = vmul.f32 %v218_v2, %v218_v2  ;;  %vm576_vm2 = vmpackc.low %vm221_vm1, %vm221_vm1  ;;  %v816_v11 = vmov 1.0   ;;  %v400_v17 = vlaneseq  ;;  %s550_s21 = sshll.u32 %s799_s12, 7  ;;  %s216_s26 = scalar_lea.vmem [#allocation7], %s541_s5  ;;  %vm408_vm7 = vcmask 130048  }
  0x5b   : > { %574 = vmatprep.subr.bf16.mxu0 %v813_v0  ;;  %564 = vmatprep.mubr.msk.f32.mxu0 %vm814_vm0, %v815_v1  ;;  %v302_v6 = vmul.f32 %v219_v3, %v219_v3  ;;  %v575_v7 = vpack.c.bf16 %v219_v3, %v218_v2  ;;  %v389_v8 = vmul.f32 %v220_v4, %v220_v4  ;;  %s425_s30 = sshll.u32 %s216_s26, 4  ;;  %s1008_s29 = scalar_lea.hbm %s1059_s2, %s550_s21  ;;  %s1010_s30 = int_to_ptr.vmem [resolvable:$true] %s425_s30 }
  0x5c   : > { %v401_v19 = vshrl.u32 %v400_v17, 7  ;;  %s411_s3 = scalar_lea.sflag [#allocation4], %s981_s18  ;;  %s721_s25 = scalar_lea.vmem %s1010_s30, 128 }
  0x5d   : > { %v579_v9 = vpack.c.bf16 %v302_v6, %v301_v5  ;;  %577 = vmatpush3.bf16.xpose.msk.msra.mxu0 %vm576_vm2, %v575_v7  ;;  %v390_v10 = vsel %vm221_vm1, %v389_v8, 0.0  ;;  %p722_p8 = scmp.ne.s32.totalorder %s1010_s30, %s721_s25  ;;  %p1071_p0 = scmp.ne.s32.totalorder %s1064_s22, 0 }
  0x5e   : > { %391 = vadd.xlane.f32.xlu0 %v390_v10  ;;  %v402_v23 = vsub.s32 0, %v401_v19  ;;  %s817_s12 = smov [#allocation7]  }
  0x5f   : > { %581 = vmatpush3.bf16.xpose.msk.msra.mxu1 %vm576_vm2, %v579_v9  ;;  %p723_p11 = pnand %p722_p8, %p1071_p0  ;;  %s725_s7 = sshll.u32 %s817_s12, 4  ;;  %s726_s7 = int_to_ptr.vmem [resolvable:$false] %s725_s7 }
  0x60   : > { %s727_s8 = scalar_lea.vmem %s726_s7, 256  ;;  %p728_p7 = scmp.lt.s32.totalorder %s1010_s30, %s726_s7 }
  0x61   : > { %p724_p4 = pneg %p723_p11  ;;  %p729_p10 = scmp.lt.s32.totalorder %s727_s8, %s721_s25 }
  0x63   : > { %p730_p12 = por %p729_p10, %p728_p7 }
  0x64   : > { %565 = vmatmul.mubr.msk.f32.vlgmr.msra.gmra.mrb[0].mxu0 %vm221_vm1, %v220_v4 }
  0x65   : > { %p731_p9 = pnand %p730_p12, %p724_p4 }
  0x66   : > { %572 = vmatmul.mubr.msk.f32.vlgmr.msra.gmra.mrb[0].mxu1 %vm221_vm1, %v816_v11 }
  0xeb   : > { %v392_v12 = vpop.xlane.xlu0 %391 }
  0xec   : > { %655 = vrsqrt.f32 %v392_v12  ;;  %vm395_vm3 = vcmp.eq.f32.partialorder %v392_v12, inf  ;;  %v398_v24 = vand.u32 2147483648, %v392_v12  ;;  %vm397_vm5 = vcmp.eq.f32.partialorder %v392_v12, 0.0 }
  0xf6   : > { %v656_v18 = vpop.eup %655 }
  0xf7   : > { %v394_v20 = vmul.f32 %v656_v18, %v392_v12 }
  0xf9   : > { %v396_v26 = vsel %vm395_vm3, %v392_v12, %v394_v20 }
  0xfa   : > { %v399_v30 = vsel %vm397_vm5, %v398_v24, %v396_v26 }
 0x137   : > { %v297_v13 = vpop.f32.mrb[0].mxu0 }
 0x138   : > { %v566_v14 = vpop.f32.mrb[1].mxu0 }
 0x139   : > { %v378_v15 = vpop.f32.mrb[0].mxu1 }
 0x13a   : > { %657 = vrsqrt.f32 %v378_v15  ;;  %v573_v16 = vpop.f32.mrb[1].mxu1  ;;  %vm384_vm4 = vcmp.eq.f32.partialorder %v378_v15, inf  ;;  %v387_v25 = vand.u32 2147483648, %v378_v15  ;;  %vm386_vm6 = vcmp.eq.f32.partialorder %v378_v15, 0.0 }
 0x144   : > { %v658_v21 = vpop.eup %657 }
 0x145   : > { %v383_v22 = vmul.f32 %v658_v21, %v378_v15 }
 0x147   : > { %v385_v27 = vsel %vm384_vm4, %v378_v15, %v383_v22 }
 0x148   : > { %v388_v28 = vsel %vm386_vm6, %v387_v25, %v385_v27 }
 0x149   : > { %v403_v29 = vrot.slane %v388_v28, %v402_v23 }
 0x14b   : > { %v404_v31 = vmul.f32 %v403_v29, %v399_v30 }
 0x14d   : > { %v405_v32 = vmax.f32 %v404_v31, 1e-08 }
 0x14f   : > { %659 = vrcp.f32 %v405_v32 }
 0x159   : > { %v660_v33 = vpop.eup %659 }
 0x15a   : > { %v407_v34 = vmul.f32 %v660_v33, %v297_v13 }
 0x15c   : > { %409 = vst.msk [vmem:[%s216_s26] sm:$0xff] %vm408_vm7, %v407_v34 }
 0x15d   : > { %734 = shalt.err (!%p731_p9)
}
 0x15e   : > { %s735_s16 = scalar_lea.hbm %s1008_s29, 128  ;;  %s739_s4 = scalar_lea.hbm %s1059_s2, 256 }
 0x15f   : > { %p736_p1 = scmp.ne.s32.totalorder %s1008_s29, %s735_s16  ;;  %p740_p5 = scmp.lt.u32.totalorder %s1008_s29, %s1059_s2 }
 0x160   : > { %p741_p13 = scmp.lt.u32.totalorder %s739_s4, %s735_s16  ;;  %p743_p8 = scmp.lt.u32.totalorder %s735_s16, %s1008_s29 }
 0x161   : > { %p737_p6 = pnand %p736_p1, %p1071_p0 }
 0x162   : > { %p742_p3 = por %p741_p13, %p740_p5 }
 0x163   : > { %p738_p2 = pneg %p737_p6 }
 0x164   : > { %p744_p11 = por %p743_p8, %p742_p3 }
 0x166   : > { %p745_p4 = pnand %p744_p11, %p738_p2 }
 0x168   : > { %748 = shalt.err (!%p745_p4)
}
 0x169   : > { %586 = dma.vmem_to_hbm [thread:$0]  (%p1071_p0), %s1010_s30, 128, %s1008_s29, %s411_s3  }
 0x16a PF: > { %s437_s15 = sand.u32 1, %s787_s9   ;;  %p1072_p7 = scmp.ne.s32.totalorder %s1065_s24, 0 }
 0x16b   : > { %p1073_p10 = scmp.ge.s32.totalorder %s807_s14, 2  ;;  %s438_s19 = scalar_lea.sflag [#allocation4], %s437_s15 }
 0x16d   : > { %p596_p12 = pnand %p1073_p10, %p1072_p7 }
 0x16f   : > { %782 = dma.done.wait (!%p596_p12), %s438_s19, 128  }
 0x170   : > { %784 = vsyncadd (!%p596_p12), %s438_s19, 4294967168  ;;  %s21_s14 = sadd.s32 1, %s807_s14   ;;  %s1074_s9 = smov %s791_s10 }
 0x171   : > { %p18_p9 = scmp.ge.s32.totalorder %s21_s14, 4   ;;  %s1075_s10 = smov %s795_s11 }
 0x172   : > { %s1076_s11 = smov %s889_s23  ;;  %s1077_s12 = smov %s803_s13 }
 0x173   : > { %s1078_s13 = smov %s1080_s17  ;;  %20 = sbr.rel (!%p18_p9) target bundleno = 8 (0x8), region = 86 }
 0x17a   :  { %443 = vsyncpa [#allocation3], 1 }
 0x17b   :  { %445 = vsyncpa [#allocation3 + $0x1], 1 }
 0x17c   :  { %446 = vsyncpa [#allocation6], 1 }
 0x17d   :  { %448 = vsyncpa [#allocation6 + $0x1], 1 }
 0x17e   :  { %449 = vsyncpa [#allocation4], 1 }
 0x17f   :  { %451 = vsyncpa [#allocation4 + $0x1], 1 }

</bundles_post_ra>
